<compile_context>
chip_gen: v7x
topology: tpu7x:2x2x1
jax: 0.10.0
libtpu: 0.0.40
codegen_flags: <defaults>
</compile_context>

<pallas_src>
import jax
import jax.numpy as jnp
from jax.experimental import pallas as pl
from jax.experimental.pallas import tpu as pltpu

_LANE = 128
_SUBLANE = 8


def _round_up(x, m):
    return ((x + m - 1) // m) * m


def _merge_kernel(x1_ref, x2_ref, w1a_ref, w1b_ref, b1_ref, w2_ref, b2_ref, o_ref):
    compute_dtype = w1a_ref.dtype
    # No-op casts if the caller already streams bf16 activations.
    x1 = x1_ref[...].astype(compute_dtype)
    x2 = x2_ref[...].astype(compute_dtype)
    # Layer 1: torch.cat([x1, x2]) @ w1 is replaced by two accumulating MXU
    # dots against the two halves of w1 (same FLOPs, no concat copy, true K).
    h = jnp.dot(x1, w1a_ref[...], preferred_element_type=jnp.float32)
    h = h + jnp.dot(x2, w1b_ref[...], preferred_element_type=jnp.float32)
    h = jnp.maximum(h + b1_ref[...], 0.0)
    # Layer 2: out = h @ w2 + b2; cast only at the final store.
    out = jnp.dot(h.astype(compute_dtype), w2_ref[...],
                  preferred_element_type=jnp.float32)
    o_ref[...] = (out + b2_ref[...]).astype(o_ref.dtype)


def init_params(key, dim1, dim2, dim3, dim4, dtype=jnp.float32):
    """Xavier-normal weights ([in, out] layout, i.e. transpose of nn.Linear's
    [out, in]) and PyTorch-default uniform biases."""
    k1, k2, k3, k4 = jax.random.split(key, 4)
    fan_in1, fan_out1 = dim1 + dim2, dim3
    fan_in2, fan_out2 = dim3, dim4
    std1 = (2.0 / (fan_in1 + fan_out1)) ** 0.5
    std2 = (2.0 / (fan_in2 + fan_out2)) ** 0.5
    w1 = (std1 * jax.random.normal(k1, (fan_in1, fan_out1))).astype(dtype)
    w2 = (std2 * jax.random.normal(k2, (fan_in2, fan_out2))).astype(dtype)
    bnd1 = 1.0 / (fan_in1 ** 0.5)
    bnd2 = 1.0 / (fan_in2 ** 0.5)
    b1 = jax.random.uniform(k3, (dim3,), minval=-bnd1, maxval=bnd1).astype(dtype)
    b2 = jax.random.uniform(k4, (dim4,), minval=-bnd2, maxval=bnd2).astype(dtype)
    return w1, b1, w2, b2


def prepare_params(w1, b1, w2, b2, dim1, dim2, compute_dtype=jnp.bfloat16):
    """One-time prep: split w1 at the concat boundary and pad ONLY the hidden
    dim (dim3) to a lane multiple.  Activations / output are never padded, so
    no per-call HBM pad/slice traffic.  Weights stored in `compute_dtype`
    (bf16 by default; pass jnp.float32 for an exact-precision path -- the
    PyTorch module is f32, bf16 dot error grows with dim1+dim2/dim3)."""
    dim3 = w1.shape[1]
    dim4 = w2.shape[1]
    d3p = _round_up(dim3, _LANE)
    w1a = jnp.zeros((dim1, d3p), compute_dtype).at[:, :dim3].set(
        w1[:dim1].astype(compute_dtype))
    w1b = jnp.zeros((dim2, d3p), compute_dtype).at[:, :dim3].set(
        w1[dim1:].astype(compute_dtype))
    w2p = jnp.zeros((d3p, dim4), compute_dtype).at[:dim3, :].set(
        w2.astype(compute_dtype))
    b1p = jnp.zeros((1, d3p), jnp.float32).at[0, :dim3].set(b1.astype(jnp.float32))
    b2p = b2.astype(jnp.float32).reshape(1, dim4)
    return w1a, w1b, b1p, w2p, b2p


def _pick_batch_tile(B, dim1, dim2, d3p, dim4, in_bytes, out_bytes, block_b):
    # Balanced tiles: pad < 8 rows total instead of rounding B up to block_b.
    n_tiles = max(1, pl.cdiv(B, block_b))
    # v7x has 2 TensorCores: make the parallel batch grid have >= 2 steps
    # whenever the batch is big enough to split (harmless on v5e/v6e).
    if n_tiles < 2 and B >= 2 * _SUBLANE:
        n_tiles = 2
    tb = _round_up(pl.cdiv(B, n_tiles), _SUBLANE)
    # VMEM ceiling: double-buffered x/out tiles + ~6 B/elem of (f32 + bf16)
    # hidden temporaries must fit next to the resident weights; keep well
    # under v7x's 64 MiB/TC.
    per_row = 2 * (dim1 + dim2) * in_bytes + 2 * dim4 * out_bytes + 6 * d3p
    budget = 40 * (1 << 20)
    max_tb = max(_SUBLANE, (budget // max(per_row, 1)) // _SUBLANE * _SUBLANE)
    return min(tb, max_tb)


def merge_layer_forward(x1, x2, params, *, block_b=512):
    """Fused MergeLayer forward. x1: [B, dim1], x2: [B, dim2] -> [B, dim4]."""
    w1a, w1b, b1p, w2p, b2p = params
    B, dim1 = x1.shape
    dim2 = x2.shape[1]
    d3p = w1a.shape[1]
    dim4 = w2p.shape[1]

    out_dtype = x1.dtype
    in_bytes = jnp.dtype(x1.dtype).itemsize
    out_bytes = jnp.dtype(out_dtype).itemsize
    w_bytes = jnp.dtype(w1a.dtype).itemsize

    tb = _pick_batch_tile(B, dim1, dim2, d3p, dim4, in_bytes, out_bytes, block_b)
    grid = (pl.cdiv(B, tb),)  # ragged last block is masked by Pallas

    # Explicit VMEM budget (v5e scoped default is only 16 MiB); weights are
    # single-buffered (Buffered(1)), x/out tiles double-buffered.
    weight_bytes = (w1a.size + w1b.size + w2p.size) * w_bytes \
        + (b1p.size + b2p.size) * 4
    act_bytes = 2 * tb * (dim1 + dim2) * in_bytes + 2 * tb * dim4 * out_bytes
    scratch_bytes = 6 * tb * d3p
    vmem_limit = int(min(max(1.25 * (weight_bytes + act_bytes + scratch_bytes),
                             32 * (1 << 20)), 96 * (1 << 20)))

    flops = 2 * B * (dim1 + dim2) * d3p + 2 * B * d3p * dim4
    bytes_accessed = int(x1.size * in_bytes + x2.size * in_bytes
                         + weight_bytes + B * dim4 * out_bytes)

    def resident(shape):  # constant-index block, single-buffered
        return pl.BlockSpec(shape, lambda i: (0, 0), pipeline_mode=pl.Buffered(1))

    return pl.pallas_call(
        _merge_kernel,
        out_shape=jax.ShapeDtypeStruct((B, dim4), out_dtype),
        grid_spec=pltpu.PrefetchScalarGridSpec(
            num_scalar_prefetch=0,
            grid=grid,
            in_specs=[
                pl.BlockSpec((tb, dim1), lambda i: (i, 0)),   # x1 tile
                pl.BlockSpec((tb, dim2), lambda i: (i, 0)),   # x2 tile
                resident((dim1, d3p)),                        # w1[:dim1]
                resident((dim2, d3p)),                        # w1[dim1:]
                resident((1, d3p)),                           # b1
                resident((d3p, dim4)),                        # w2
                resident((1, dim4)),                          # b2
            ],
            out_specs=pl.BlockSpec((tb, dim4), lambda i: (i, 0)),
        ),
        compiler_params=pltpu.CompilerParams(
            dimension_semantics=("parallel",),
            vmem_limit_bytes=vmem_limit),
        cost_estimate=pl.CostEstimate(flops=flops, transcendentals=0,
                                      bytes_accessed=bytes_accessed),
    )(x1, x2, w1a, w1b, b1p, w2p, b2p)


if __name__ == "__main__":
    # Small shapes consistent with the module: x1 [B, dim1], x2 [B, dim2].
    B, dim1, dim2, dim3, dim4 = 8, 16, 16, 32, 16

    key = jax.random.PRNGKey(0)
    kx1, kx2, kp = jax.random.split(key, 3)
    x1 = jax.random.normal(kx1, (B, dim1), dtype=jnp.float32)
    x2 = jax.random.normal(kx2, (B, dim2), dtype=jnp.float32)

    w1, b1, w2, b2 = init_params(kp, dim1, dim2, dim3, dim4)
    params = prepare_params(w1, b1, w2, b2, dim1, dim2)

    out = merge_layer_forward(x1, x2, params)
    out = jax.block_until_ready(out)
    assert out.shape == (B, dim4), out.shape

    # Pure-JAX references.
    x = jnp.concatenate([x1, x2], axis=1)
    ref_f32 = jnp.maximum(x @ w1 + b1, 0.0) @ w2 + b2
    # bf16-matched reference (same casts as the kernel) for a tighter check.
    h_bf = jnp.dot(x.astype(jnp.bfloat16), w1.astype(jnp.bfloat16),
                   preferred_element_type=jnp.float32) + b1
    ref_bf = jnp.dot(jnp.maximum(h_bf, 0.0).astype(jnp.bfloat16),
                     w2.astype(jnp.bfloat16),
                     preferred_element_type=jnp.float32) + b2
    assert jnp.allclose(out, ref_bf, atol=1e-2, rtol=1e-2)
    assert jnp.allclose(out, ref_f32, atol=5e-2, rtol=5e-2)

    # Ragged-batch / multi-tile path: partial last block is masked by Pallas
    # (no host-side pad or post-kernel slice); padded rows are never read back.
    B2 = 20
    x1b = jax.random.normal(kx1, (B2, dim1), dtype=jnp.float32)
    x2b = jax.random.normal(kx2, (B2, dim2), dtype=jnp.float32)
    out2 = jax.block_until_ready(merge_layer_forward(x1b, x2b, params))
    xb = jnp.concatenate([x1b, x2b], axis=1)
    ref2 = jnp.maximum(xb @ w1 + b1, 0.0) @ w2 + b2
    assert out2.shape == (B2, dim4), out2.shape
    assert jnp.allclose(out2, ref2, atol=5e-2, rtol=5e-2)

    print("KERNEL_OK")
</pallas_src>

<mosaic_0001>
module attributes {stable_mosaic.version = 11 : i64} {
  func.func @_merge_kernel(%arg0: i32, %arg1: memref<8x16xf32, #tpu.memory_space<vmem>>, %arg2: memref<8x16xf32, #tpu.memory_space<vmem>>, %arg3: memref<16x128xbf16, #tpu.memory_space<vmem>>, %arg4: memref<16x128xbf16, #tpu.memory_space<vmem>>, %arg5: memref<1x128xf32, #tpu.memory_space<vmem>>, %arg6: memref<128x16xbf16, #tpu.memory_space<vmem>>, %arg7: memref<1x16xf32, #tpu.memory_space<vmem>>, %arg8: memref<8x16xf32, #tpu.memory_space<vmem>>) attributes {dimension_semantics = [#tpu.dimension_semantics<parallel>], iteration_bounds = array<i64: 1>, scalar_prefetch = 0 : i64, scratch_operands = 0 : i64, tpu.core_type = #tpu.core_type<tc>, window_params = [{transform_indices = @transform_0, window_bounds = array<i64: 8, 16>}, {transform_indices = @transform_1, window_bounds = array<i64: 8, 16>}, {pipeline_mode = #tpu.pipeline_mode<synchronous>, transform_indices = @transform_2, window_bounds = array<i64: 16, 128>}, {pipeline_mode = #tpu.pipeline_mode<synchronous>, transform_indices = @transform_3, window_bounds = array<i64: 16, 128>}, {pipeline_mode = #tpu.pipeline_mode<synchronous>, transform_indices = @transform_4, window_bounds = array<i64: 1, 128>}, {pipeline_mode = #tpu.pipeline_mode<synchronous>, transform_indices = @transform_5, window_bounds = array<i64: 128, 16>}, {pipeline_mode = #tpu.pipeline_mode<synchronous>, transform_indices = @transform_6, window_bounds = array<i64: 1, 16>}, {transform_indices = @transform_7, window_bounds = array<i64: 8, 16>}]} {
    %c0 = arith.constant 0 : index
    %c0_0 = arith.constant 0 : index
    %0 = vector.load %arg1[%c0, %c0_0] : memref<8x16xf32, #tpu.memory_space<vmem>>, vector<8x16xf32>
    %1 = arith.truncf %0 : vector<8x16xf32> to vector<8x16xbf16>
    %c0_1 = arith.constant 0 : index
    %c0_2 = arith.constant 0 : index
    %2 = vector.load %arg2[%c0_1, %c0_2] : memref<8x16xf32, #tpu.memory_space<vmem>>, vector<8x16xf32>
    %3 = arith.truncf %2 : vector<8x16xf32> to vector<8x16xbf16>
    %c0_3 = arith.constant 0 : index
    %c0_4 = arith.constant 0 : index
    %4 = vector.load %arg3[%c0_3, %c0_4] : memref<16x128xbf16, #tpu.memory_space<vmem>>, vector<16x128xbf16>
    %cst = arith.constant dense<0.000000e+00> : vector<8x128xf32>
    %5 = tpu.matmul %1, %4, %cst {dimension_numbers = #tpu.dot_dimension_numbers<[1], [0], [0], [1], [0, 0, 1, 1], [], []>} : vector<8x16xbf16>, vector<16x128xbf16>, vector<8x128xf32> -> vector<8x128xf32>
    %c0_5 = arith.constant 0 : index
    %c0_6 = arith.constant 0 : index
    %6 = vector.load %arg4[%c0_5, %c0_6] : memref<16x128xbf16, #tpu.memory_space<vmem>>, vector<16x128xbf16>
    %cst_7 = arith.constant dense<0.000000e+00> : vector<8x128xf32>
    %7 = tpu.matmul %3, %6, %cst_7 {dimension_numbers = #tpu.dot_dimension_numbers<[1], [0], [0], [1], [0, 0, 1, 1], [], []>} : vector<8x16xbf16>, vector<16x128xbf16>, vector<8x128xf32> -> vector<8x128xf32>
    %8 = arith.addf %5, %7 : vector<8x128xf32>
    %c0_8 = arith.constant 0 : index
    %c0_9 = arith.constant 0 : index
    %9 = vector.load %arg5[%c0_8, %c0_9] : memref<1x128xf32, #tpu.memory_space<vmem>>, vector<1x128xf32>
    %10 = vector.broadcast %9 : vector<1x128xf32> to vector<8x128xf32>
    %11 = arith.addf %8, %10 : vector<8x128xf32>
    %cst_10 = arith.constant 0.000000e+00 : f32
    %12 = vector.broadcast %cst_10 : f32 to vector<8x128xf32>
    %13 = arith.maximumf %11, %12 : vector<8x128xf32>
    %14 = arith.truncf %13 : vector<8x128xf32> to vector<8x128xbf16>
    %c0_11 = arith.constant 0 : index
    %c0_12 = arith.constant 0 : index
    %15 = vector.load %arg6[%c0_11, %c0_12] : memref<128x16xbf16, #tpu.memory_space<vmem>>, vector<128x16xbf16>
    %cst_13 = arith.constant dense<0.000000e+00> : vector<8x16xf32>
    %16 = tpu.matmul %14, %15, %cst_13 {dimension_numbers = #tpu.dot_dimension_numbers<[1], [0], [0], [1], [0, 0, 1, 1], [], []>} : vector<8x128xbf16>, vector<128x16xbf16>, vector<8x16xf32> -> vector<8x16xf32>
    %c0_14 = arith.constant 0 : index
    %c0_15 = arith.constant 0 : index
    %17 = vector.load %arg7[%c0_14, %c0_15] : memref<1x16xf32, #tpu.memory_space<vmem>>, vector<1x16xf32>
    %18 = vector.broadcast %17 : vector<1x16xf32> to vector<8x16xf32>
    %19 = arith.addf %16, %18 : vector<8x16xf32>
    %c0_16 = arith.constant 0 : index
    %c0_17 = arith.constant 0 : index
    %20 = vector.load %arg8[%c0_16, %c0_17] : memref<8x16xf32, #tpu.memory_space<vmem>>, vector<8x16xf32>
    tpu.vector_store %arg8[%c0_16, %c0_17], %19 {strides = array<i32>} : memref<8x16xf32, #tpu.memory_space<vmem>>, vector<8x16xf32>,
    return
  }
  func.func @transform_0(%arg0: i32) -> (i32, i32) {
    %c0_i32 = arith.constant 0 : i32
    %c0_i32_0 = arith.constant 0 : i32
    return %arg0, %c0_i32 : i32, i32
  }
  func.func @transform_1(%arg0: i32) -> (i32, i32) {
    %c0_i32 = arith.constant 0 : i32
    %c0_i32_0 = arith.constant 0 : i32
    return %arg0, %c0_i32 : i32, i32
  }
  func.func @transform_2(%arg0: i32) -> (i32, i32) {
    %c0_i32 = arith.constant 0 : i32
    %c0_i32_0 = arith.constant 0 : i32
    %c0_i32_1 = arith.constant 0 : i32
    return %c0_i32, %c0_i32_0 : i32, i32
  }
  func.func @transform_3(%arg0: i32) -> (i32, i32) {
    %c0_i32 = arith.constant 0 : i32
    %c0_i32_0 = arith.constant 0 : i32
    %c0_i32_1 = arith.constant 0 : i32
    return %c0_i32, %c0_i32_0 : i32, i32
  }
  func.func @transform_4(%arg0: i32) -> (i32, i32) {
    %c0_i32 = arith.constant 0 : i32
    %c0_i32_0 = arith.constant 0 : i32
    %c0_i32_1 = arith.constant 0 : i32
    return %c0_i32, %c0_i32_0 : i32, i32
  }
  func.func @transform_5(%arg0: i32) -> (i32, i32) {
    %c0_i32 = arith.constant 0 : i32
    %c0_i32_0 = arith.constant 0 : i32
    %c0_i32_1 = arith.constant 0 : i32
    return %c0_i32, %c0_i32_0 : i32, i32
  }
  func.func @transform_6(%arg0: i32) -> (i32, i32) {
    %c0_i32 = arith.constant 0 : i32
    %c0_i32_0 = arith.constant 0 : i32
    %c0_i32_1 = arith.constant 0 : i32
    return %c0_i32, %c0_i32_0 : i32, i32
  }
  func.func @transform_7(%arg0: i32) -> (i32, i32) {
    %c0_i32 = arith.constant 0 : i32
    %c0_i32_0 = arith.constant 0 : i32
    return %arg0, %c0_i32 : i32, i32
  }
}

</mosaic_0001>

<bundles_post_ra>
// kernel: tpu_custom_call.1
= control target key start
LH: loop header
LB: loop body
LE: loop exit
PB: predicated region body
PF: predicated region fallthrough
CT: control target
= control target key end

     0   :  { %v367_v1 = vmov 0.0   ;;  %vm368_vm0 = vmmov 0   ;;  %vm42_vm1 = vcmask 130048   ;;  %s467_s0 = inlined_call_operand.vmem [shape: f32[8,16], index: 0, kind: input, shape index: {}]   ;;  %s468_s1 = inlined_call_operand.vmem [shape: f32[8,16], index: 1, kind: input, shape index: {}]   ;;  %s469_s2 = inlined_call_operand.vmem [shape: bf16[16,128], index: 2, kind: input, shape index: {}]   ;;  %s470_s3 = inlined_call_operand.vmem [shape: bf16[16,128], index: 3, kind: input, shape index: {}]   ;;  %s471_s4 = inlined_call_operand.vmem [shape: f32[1,128], index: 4, kind: input, shape index: {}]   ;;  %s472_s5 = inlined_call_operand.vmem [shape: bf16[128,16], index: 5, kind: input, shape index: {}]   ;;  %s473_s6 = inlined_call_operand.vmem [shape: f32[1,16], index: 6, kind: input, shape index: {}]   ;;  %s474_s7 = inlined_call_operand.hbm [shape: f32[8,16], index: 7, kind: output, shape index: {}]  }
   0x1   :  { %v333_v0 = vld [vmem:[%s470_s3] sm:$0xff]   ;;  %298 = vmatprep.subr.bf16.mxu1 %v367_v1  ;;  %310 = vmatprep.subr.bf16.mxu0 %v367_v1  ;;  %v336_v6 = vld [vmem:[%s472_s5 + $0x8] sm:$0xff]   ;;  %v337_v9 = vld [vmem:[%s472_s5 + $0x10] sm:$0xff]  }
   0x2   :  { %v30_v2 = vld [vmem:[%s468_s1] sm:$0xff]  ;;  %299 = vmatpush3.bf16.msra.mxu1 %v333_v0  ;;  %300 = vmatprep.mubr.msk.bf16.mxu1 %vm368_vm0, %v367_v1 }
   0x3   :  { %v31_v3 = vpack.c.bf16 %v30_v2, %v30_v2  ;;  %v334_v4 = vld [vmem:[%s469_s2] sm:$0xff]   ;;  %304 = vmatprep.subr.bf16.mxu1 %v367_v1  ;;  %326 = vmatprep.mubr.msk.bf16.mxu0 %vm368_vm0, %v367_v1 }
   0x4   :  { %v335_v5 = vld [vmem:[%s472_s5] sm:$0xff]  }
   0x5   :  { %301 = vmatmul.mubr.msk.bf16.vlgmr.msra.gmra.mrb[0].mxu1 %vm42_vm1, %v31_v3  ;;  %311 = vmatpush3.bf16.msra.mxu0 %v335_v5  ;;  %v28_v7 = vld [vmem:[%s467_s0] sm:$0xff] }
   0x6   :  { %305 = vmatpush3.bf16.msra.mxu1 %v334_v4  ;;  %306 = vmatprep.mubr.msk.bf16.mxu1 %vm368_vm0, %v367_v1  ;;  %v29_v8 = vpack.c.bf16 %v28_v7, %v28_v7 }
   0x7   :  { %312 = vmatprep.subr.bf16.mxu0 %v367_v1 }
   0x9   :  { %313 = vmatpush3.bf16.msra.mxu0 %v336_v6 }
   0xa   :  { %12 = vsyncpa [#allocation3], 0  ;;  %314 = vmatprep.subr.bf16.mxu0 %v367_v1  ;;  %v338_v10 = vld [vmem:[%s472_s5 + $0x18] sm:$0xff]   ;;  %v339_v11 = vld [vmem:[%s472_s5 + $0x20] sm:$0xff]   ;;  %s369_s24 = smov [#allocation2]  }
   0xb   :  { %v340_v12 = vld [vmem:[%s472_s5 + $0x28] sm:$0xff]   ;;  %v341_v13 = vld [vmem:[%s472_s5 + $0x30] sm:$0xff]   ;;  %v342_v14 = vld [vmem:[%s472_s5 + $0x38] sm:$0xff]   ;;  %s263_s25 = sshll.u32 %s369_s24, 4  ;;  %s264_s25 = int_to_ptr.vmem [resolvable:$true] %s263_s25 }
   0xc   :  { %v275_v20 = vld [vmem:[%s471_s4] ss:$0 sm:$0xff]  ;;  %s343_s4 = scalar_lea.vmem %s264_s25, 128  ;;  %p348_p1 = scmp.lt.s32.totalorder %s264_s25, %s264_s25 }
   0xd   :  { %307 = vmatmul.mubr.msk.bf16.vlgmr.msra.gmra.mrb[4].mxu1 %vm42_vm1, %v29_v8  ;;  %315 = vmatpush3.bf16.msra.mxu0 %v337_v9  ;;  %v276_v28 = vld [vmem:[%s473_s6] ss:$0 sm:$0xff]  ;;  %p344_p0 = scmp.ne.s32.totalorder %s264_s25, %s343_s4  ;;  %p349_p2 = scmp.lt.s32.totalorder %s343_s4, %s343_s4 }
   0xe   :  { %316 = vmatprep.subr.bf16.mxu0 %v367_v1 }
   0xf   :  { %p350_p3 = por %p349_p2, %p348_p1 }
  0x11   :  { %317 = vmatpush3.bf16.msra.mxu0 %v338_v10  ;;  %p351_p4 = pnand %p350_p3, %p344_p0 }
  0x12   :  { %318 = vmatprep.subr.bf16.mxu0 %v367_v1 }
  0x15   :  { %319 = vmatpush3.bf16.msra.mxu0 %v339_v11 }
  0x16   :  { %320 = vmatprep.subr.bf16.mxu0 %v367_v1 }
  0x19   :  { %321 = vmatpush3.bf16.msra.mxu0 %v340_v12 }
  0x1a   :  { %322 = vmatprep.subr.bf16.mxu0 %v367_v1 }
  0x1d   :  { %323 = vmatpush3.bf16.msra.mxu0 %v341_v13 }
  0x1e   :  { %324 = vmatprep.subr.bf16.mxu0 %v367_v1 }
  0x21   :  { %325 = vmatpush3.bf16.msra.mxu0 %v342_v14 }
  0xd8   :  { %v80_v15 = vpop.f32.mrb[0].mxu1 }
  0xd9   :  { %v302_v16 = vpop.f32.mrb[1].mxu1 }
  0xda   :  { %v83_v17 = vpop.f32.mrb[2].mxu1 }
  0xdb   :  { %v303_v18 = vpop.f32.mrb[3].mxu1 }
  0xe0   :  { %v129_v19 = vpop.f32.mrb[4].mxu1 }
  0xe1   :  { %v130_v21 = vadd.f32 %v129_v19, %v80_v15  ;;  %v308_v22 = vpop.f32.mrb[5].mxu1 }
  0xe2   :  { %v132_v23 = vpop.f32.mrb[6].mxu1 }
  0xe3   :  { %v142_v24 = vadd.f32 %v275_v20, %v130_v21  ;;  %v309_v25 = vpop.f32.mrb[7].mxu1 }
  0xe5   :  { %v143_v26 = vmax.f32 %v142_v24, 0.0 }
  0xe7   :  { %v144_v27 = vpack.c.bf16 %v143_v26, %v143_v26 }
  0xe9   :  { %327 = vmatmul.mubr.bf16.vlgmr.msra.gmra.mrb[0].mxu0 %v144_v27 }
 0x1bc   :  { %v250_v29 = vpop.f32.mrb[0].mxu0 }
 0x1bd   :  { %v251_v30 = vadd.f32 %v276_v28, %v250_v29  ;;  %v328_v31 = vpop.f32.mrb[1].mxu0 }
 0x1be   :  { %v253_v32 = vpop.f32.mrb[2].mxu0 }
 0x1bf   :  { %256 = vst.msk [vmem:[#allocation2] sm:$0xff] %vm42_vm1, %v251_v30  ;;  %v329_v33 = vpop.f32.mrb[3].mxu0 }
 0x1c0   :  { %354 = shalt.err (!%p351_p4)
}
 0x1c1   :  { %s355_s6 = scalar_lea.hbm %s474_s7, 128 }
 0x1c2   :  { %p356_p5 = scmp.ne.s32.totalorder %s474_s7, %s355_s6  ;;  %p359_p6 = scmp.lt.u32.totalorder %s355_s6, %s474_s7 }
 0x1c4   :  { %p361_p7 = pnand %p359_p6, %p356_p5 }
 0x1c6   :  { %364 = shalt.err (!%p361_p7)
}
 0x1c7   :  { %266 = dma.vmem_to_hbm [thread:$0]  %s264_s25, 128, %s474_s7, [#allocation3]  }
 0x1c8   :  { %365 = dma.done.wait [#allocation3], 128  }
 0x1c9   :  { %366 = vsyncadd [#allocation3], 4294967168 }
 0x1ca   :  { %270 = vsyncpa [#allocation3], 1 }

</bundles_post_ra>
